<compile_context>
chip_gen: v6e
topology: v6e:2x2x1
jax: 0.10.0
libtpu: 0.0.40
codegen_flags: <defaults>
</compile_context>

<pallas_src>
import functools

import jax
import jax.numpy as jnp
from jax.experimental import pallas as pl
from jax.experimental.pallas import tpu as pltpu

# ---------------- config (small, synthetic demo; real BERT uses H=768/1024) --
BATCH = 2
SEQ = 8
HIDDEN = 32          # demo only: at H=32 stores are masked / MXU underfilled.
LN_EPS = 1e-12

# MXU input dtype: bf16 feeds the MXU at full rate and halves weight HBM
# traffic; accumulation is always f32 via preferred_element_type.
MXU_DTYPE = jnp.bfloat16

_INV_SQRT2 = 0.7071067811865476
_SQRT_2_OVER_PI = 0.7978845608028654


# ---------------- fused kernel: dense + gelu + layernorm ----------------
def transform_kernel(x_ref, w_ref, b_ref, gamma_ref, beta_ref, o_ref,
                     *, approx_gelu, ln_eps):
    # (TM, H) @ (H, H) on the MXU, bf16 in / f32 accumulate.
    x = x_ref[...].astype(MXU_DTYPE)          # no-op when activations are bf16
    h = jnp.dot(x, w_ref[...], preferred_element_type=jnp.float32)
    h = h + b_ref[...].astype(jnp.float32)

    if approx_gelu:
        # tanh GELU: transcendental runs on the EUP slot, freeing VALU (v6e/v7x).
        inner = jnp.float32(_SQRT_2_OVER_PI) * (
            h + jnp.float32(0.044715) * h * h * h)
        h = 0.5 * h * (1.0 + jnp.tanh(inner))
    else:
        # exact erf GELU — matches BERT's default ACT2FN["gelu"]
        h = 0.5 * h * (1.0 + jax.lax.erf(h * jnp.float32(_INV_SQRT2)))

    # LayerNorm over the hidden (last) dim; (h - mu) computed exactly once.
    inv_h = jnp.float32(1.0 / h.shape[-1])
    mu = jnp.sum(h, axis=-1, keepdims=True) * inv_h
    hm = h - mu
    var = jnp.sum(hm * hm, axis=-1, keepdims=True) * inv_h
    inv_std = jax.lax.rsqrt(var + jnp.float32(ln_eps))   # EUP
    o_ref[...] = (hm * inv_std * gamma_ref[...].astype(jnp.float32)
                  + beta_ref[...].astype(jnp.float32)).astype(o_ref.dtype)


# ---------------- wrapper ----------------
def bert_prediction_head_transform(hidden_states, params, *, tm=512,
                                   approx_gelu=False):
    B, S, H = hidden_states.shape
    M = B * S
    x2d = hidden_states.reshape(M, H)

    # Pad rows only to the 8-row sublane boundary (<= 7 rows, negligible copy).
    m_pad = pl.cdiv(M, 8) * 8
    if m_pad != M:
        x2d = jnp.pad(x2d, ((0, m_pad - M), (0, 0)))

    # Snap the row tile to a multiple of 8 that divides the padded row count,
    # so no ragged blocks and no whole-array pad are ever needed.
    tm = max(8, min((tm // 8) * 8, m_pad))
    while m_pad % tm != 0:
        tm -= 8
    grid = (m_pad // tm,)

    out_dtype = hidden_states.dtype   # bf16 in -> bf16 out; f32 in -> f32 out
    x_bytes = x2d.dtype.itemsize
    w_bytes = params["dense_w"].dtype.itemsize
    o_bytes = jnp.dtype(out_dtype).itemsize

    # CostEstimate kept in sync with the actual dtypes / traffic.
    cost = pl.CostEstimate(
        flops=2 * m_pad * H * H + 10 * m_pad * H,
        transcendentals=m_pad * (H + 1),      # gelu per element + rsqrt per row
        bytes_accessed=(m_pad * H * x_bytes                     # activations in
                        + H * H * w_bytes                       # resident weight
                        + 3 * H * 4                             # bias/gamma/beta
                        + m_pad * H * o_bytes),                 # activations out
    )

    # VMEM budget: double-buffered in/out tiles + resident weight (still
    # double-buffered by the default pipeline) + f32 intermediate headroom.
    vmem_est = (2 * tm * H * x_bytes
                + 2 * tm * H * o_bytes
                + 2 * H * H * w_bytes
                + 2 * 3 * H * 4
                + 3 * tm * H * 4)
    vmem_limit = min(64 << 20, max(32 << 20, int(vmem_est * 1.25)))

    kernel = functools.partial(transform_kernel,
                               approx_gelu=approx_gelu, ln_eps=LN_EPS)

    out = pl.pallas_call(
        kernel,
        out_shape=jax.ShapeDtypeStruct((m_pad, H), out_dtype),
        grid_spec=pltpu.PrefetchScalarGridSpec(
            num_scalar_prefetch=0,
            grid=grid,
            in_specs=[
                pl.BlockSpec((tm, H), lambda i: (i, 0)),   # activations: row tiles
                pl.BlockSpec((H, H), lambda i: (0, 0)),    # weight: VMEM resident
                pl.BlockSpec((1, H), lambda i: (0, 0)),    # bias
                pl.BlockSpec((1, H), lambda i: (0, 0)),    # LN gamma
                pl.BlockSpec((1, H), lambda i: (0, 0)),    # LN beta
            ],
            out_specs=pl.BlockSpec((tm, H), lambda i: (i, 0)),
        ),
        compiler_params=pltpu.CompilerParams(
            dimension_semantics=("parallel",),
            vmem_limit_bytes=vmem_limit),
        cost_estimate=cost,
    )(x2d, params["dense_w"], params["dense_b"],
      params["ln_g"], params["ln_b"])

    return out[:M].reshape(B, S, H)


def init_params(key, hidden):
    k1, k2, k3, k4 = jax.random.split(key, 4)
    scale = 0.02
    return {
        # stored as (in, out) — transpose of torch nn.Linear weight; bf16 in HBM
        "dense_w": (scale * jax.random.normal(k1, (hidden, hidden),
                                              jnp.float32)).astype(MXU_DTYPE),
        "dense_b": scale * jax.random.normal(k2, (1, hidden), jnp.float32),
        "ln_g": 1.0 + scale * jax.random.normal(k3, (1, hidden), jnp.float32),
        "ln_b": scale * jax.random.normal(k4, (1, hidden), jnp.float32),
    }


def _reference(x, p):
    B, S, H = x.shape
    x2 = x.reshape(-1, H)
    h = jnp.dot(x2.astype(MXU_DTYPE), p["dense_w"],
                preferred_element_type=jnp.float32) + p["dense_b"]
    h = 0.5 * h * (1.0 + jax.lax.erf(h * jnp.float32(_INV_SQRT2)))
    mu = jnp.mean(h, axis=-1, keepdims=True)
    var = jnp.mean((h - mu) ** 2, axis=-1, keepdims=True)
    h = (h - mu) * jax.lax.rsqrt(var + jnp.float32(LN_EPS)) * p["ln_g"] + p["ln_b"]
    return h.reshape(B, S, H).astype(x.dtype)


if __name__ == "__main__":
    key = jax.random.PRNGKey(0)
    kx, kp = jax.random.split(key)
    hidden_states = jax.random.normal(kx, (BATCH, SEQ, HIDDEN), jnp.float32)
    params = init_params(kp, HIDDEN)

    # tm=8 so the tiny demo shapes still exercise a multi-step "parallel" grid.
    out = bert_prediction_head_transform(hidden_states, params, tm=8)
    out = jax.block_until_ready(out)

    ref = _reference(hidden_states, params)
    assert out.shape == (BATCH, SEQ, HIDDEN)
    assert jnp.allclose(out, ref, atol=1e-4, rtol=1e-4), \
        float(jnp.max(jnp.abs(out - ref)))
    print("KERNEL_OK")
</pallas_src>

<mosaic_0001>
module attributes {stable_mosaic.version = 11 : i64} {
  func.func @transform_kernel(%arg0: i32, %arg1: memref<8x32xf32, #tpu.memory_space<vmem>>, %arg2: memref<32x32xbf16, #tpu.memory_space<vmem>>, %arg3: memref<1x32xf32, #tpu.memory_space<vmem>>, %arg4: memref<1x32xf32, #tpu.memory_space<vmem>>, %arg5: memref<1x32xf32, #tpu.memory_space<vmem>>, %arg6: memref<8x32xf32, #tpu.memory_space<vmem>>) attributes {dimension_semantics = [#tpu.dimension_semantics<parallel>], iteration_bounds = array<i64: 2>, scalar_prefetch = 0 : i64, scratch_operands = 0 : i64, tpu.core_type = #tpu.core_type<tc>, window_params = [{transform_indices = @transform_0, window_bounds = array<i64: 8, 32>}, {pipeline_mode = #tpu.pipeline_mode<synchronous>, transform_indices = @transform_1, window_bounds = array<i64: 32, 32>}, {pipeline_mode = #tpu.pipeline_mode<synchronous>, transform_indices = @transform_2, window_bounds = array<i64: 1, 32>}, {pipeline_mode = #tpu.pipeline_mode<synchronous>, transform_indices = @transform_3, window_bounds = array<i64: 1, 32>}, {pipeline_mode = #tpu.pipeline_mode<synchronous>, transform_indices = @transform_4, window_bounds = array<i64: 1, 32>}, {transform_indices = @transform_5, window_bounds = array<i64: 8, 32>}]} {
    %c0 = arith.constant 0 : index
    %c0_0 = arith.constant 0 : index
    %0 = vector.load %arg1[%c0, %c0_0] : memref<8x32xf32, #tpu.memory_space<vmem>>, vector<8x32xf32>
    %1 = arith.truncf %0 : vector<8x32xf32> to vector<8x32xbf16>
    %c0_1 = arith.constant 0 : index
    %c0_2 = arith.constant 0 : index
    %2 = vector.load %arg2[%c0_1, %c0_2] : memref<32x32xbf16, #tpu.memory_space<vmem>>, vector<32x32xbf16>
    %cst = arith.constant dense<0.000000e+00> : vector<8x32xf32>
    %3 = tpu.matmul %1, %2, %cst {dimension_numbers = #tpu.dot_dimension_numbers<[1], [0], [0], [1], [0, 0, 1, 1], [], []>} : vector<8x32xbf16>, vector<32x32xbf16>, vector<8x32xf32> -> vector<8x32xf32>
    %c0_3 = arith.constant 0 : index
    %c0_4 = arith.constant 0 : index
    %4 = vector.load %arg3[%c0_3, %c0_4] : memref<1x32xf32, #tpu.memory_space<vmem>>, vector<1x32xf32>
    %5 = vector.broadcast %4 : vector<1x32xf32> to vector<8x32xf32>
    %6 = arith.addf %3, %5 : vector<8x32xf32>
    %cst_5 = arith.constant 5.000000e-01 : f32
    %7 = vector.broadcast %cst_5 : f32 to vector<8x32xf32>
    %8 = arith.mulf %7, %6 : vector<8x32xf32>
    %cst_6 = arith.constant 0.707106769 : f32
    %9 = vector.broadcast %cst_6 : f32 to vector<8x32xf32>
    %10 = arith.mulf %6, %9 : vector<8x32xf32>
    %11 = math.erf %10 : vector<8x32xf32>
    %cst_7 = arith.constant 1.000000e+00 : f32
    %12 = vector.broadcast %cst_7 : f32 to vector<8x32xf32>
    %13 = arith.addf %12, %11 : vector<8x32xf32>
    %14 = arith.mulf %8, %13 : vector<8x32xf32>
    %cst_8 = arith.constant dense<0.000000e+00> : vector<8xf32>
    %15 = vector.multi_reduction <add>, %14, %cst_8 [1] : vector<8x32xf32> to vector<8xf32>
    %16 = vector.shape_cast %15 : vector<8xf32> to vector<8x1xf32>
    %cst_9 = arith.constant 3.125000e-02 : f32
    %17 = vector.broadcast %cst_9 : f32 to vector<8x1xf32>
    %18 = arith.mulf %16, %17 : vector<8x1xf32>
    %19 = vector.broadcast %18 : vector<8x1xf32> to vector<8x32xf32>
    %20 = arith.subf %14, %19 : vector<8x32xf32>
    %21 = arith.mulf %20, %20 : vector<8x32xf32>
    %cst_10 = arith.constant dense<0.000000e+00> : vector<8xf32>
    %22 = vector.multi_reduction <add>, %21, %cst_10 [1] : vector<8x32xf32> to vector<8xf32>
    %23 = vector.shape_cast %22 : vector<8xf32> to vector<8x1xf32>
    %cst_11 = arith.constant 3.125000e-02 : f32
    %24 = vector.broadcast %cst_11 : f32 to vector<8x1xf32>
    %25 = arith.mulf %23, %24 : vector<8x1xf32>
    %cst_12 = arith.constant 9.99999996E-13 : f32
    %26 = vector.broadcast %cst_12 : f32 to vector<8x1xf32>
    %27 = arith.addf %25, %26 : vector<8x1xf32>
    %28 = math.rsqrt %27 : vector<8x1xf32>
    %29 = vector.broadcast %28 : vector<8x1xf32> to vector<8x32xf32>
    %30 = arith.mulf %20, %29 : vector<8x32xf32>
    %c0_13 = arith.constant 0 : index
    %c0_14 = arith.constant 0 : index
    %31 = vector.load %arg4[%c0_13, %c0_14] : memref<1x32xf32, #tpu.memory_space<vmem>>, vector<1x32xf32>
    %32 = vector.broadcast %31 : vector<1x32xf32> to vector<8x32xf32>
    %33 = arith.mulf %30, %32 : vector<8x32xf32>
    %c0_15 = arith.constant 0 : index
    %c0_16 = arith.constant 0 : index
    %34 = vector.load %arg5[%c0_15, %c0_16] : memref<1x32xf32, #tpu.memory_space<vmem>>, vector<1x32xf32>
    %35 = vector.broadcast %34 : vector<1x32xf32> to vector<8x32xf32>
    %36 = arith.addf %33, %35 : vector<8x32xf32>
    %c0_17 = arith.constant 0 : index
    %c0_18 = arith.constant 0 : index
    %37 = vector.load %arg6[%c0_17, %c0_18] : memref<8x32xf32, #tpu.memory_space<vmem>>, vector<8x32xf32>
    tpu.vector_store %arg6[%c0_17, %c0_18], %36 {strides = array<i32>} : memref<8x32xf32, #tpu.memory_space<vmem>>, vector<8x32xf32>,
    return
  }
  func.func @transform_0(%arg0: i32) -> (i32, i32) {
    %c0_i32 = arith.constant 0 : i32
    %c0_i32_0 = arith.constant 0 : i32
    return %arg0, %c0_i32 : i32, i32
  }
  func.func @transform_1(%arg0: i32) -> (i32, i32) {
    %c0_i32 = arith.constant 0 : i32
    %c0_i32_0 = arith.constant 0 : i32
    %c0_i32_1 = arith.constant 0 : i32
    return %c0_i32, %c0_i32_0 : i32, i32
  }
  func.func @transform_2(%arg0: i32) -> (i32, i32) {
    %c0_i32 = arith.constant 0 : i32
    %c0_i32_0 = arith.constant 0 : i32
    %c0_i32_1 = arith.constant 0 : i32
    return %c0_i32, %c0_i32_0 : i32, i32
  }
  func.func @transform_3(%arg0: i32) -> (i32, i32) {
    %c0_i32 = arith.constant 0 : i32
    %c0_i32_0 = arith.constant 0 : i32
    %c0_i32_1 = arith.constant 0 : i32
    return %c0_i32, %c0_i32_0 : i32, i32
  }
  func.func @transform_4(%arg0: i32) -> (i32, i32) {
    %c0_i32 = arith.constant 0 : i32
    %c0_i32_0 = arith.constant 0 : i32
    %c0_i32_1 = arith.constant 0 : i32
    return %c0_i32, %c0_i32_0 : i32, i32
  }
  func.func @transform_5(%arg0: i32) -> (i32, i32) {
    %c0_i32 = arith.constant 0 : i32
    %c0_i32_0 = arith.constant 0 : i32
    return %arg0, %c0_i32 : i32, i32
  }
}

</mosaic_0001>

<bundles_post_ra>
// kernel: tpu_custom_call.1
= control target key start
LH: loop header
LB: loop body
LE: loop exit
PB: predicated region body
PF: predicated region fallthrough
CT: control target
= control target key end

     0   :  { %10 = vsyncpa [#allocation3], 0  ;;  %s884_s0 = inlined_call_operand.hbm [shape: f32[16,32], index: 0, kind: input, shape index: {}]   ;;  %s885_s1 = inlined_call_operand.hbm [shape: bf16[32,32], index: 1, kind: input, shape index: {}]   ;;  %s886_s2 = inlined_call_operand.vmem [shape: f32[1,32], index: 2, kind: input, shape index: {}]   ;;  %s887_s3 = inlined_call_operand.vmem [shape: f32[1,32], index: 3, kind: input, shape index: {}]   ;;  %s888_s4 = inlined_call_operand.vmem [shape: f32[1,32], index: 4, kind: input, shape index: {}]   ;;  %s889_s5 = inlined_call_operand.hbm [shape: f32[16,32], index: 5, kind: output, shape index: {}]  }
   0x1   :  { %12 = vsyncpa [#allocation3 + $0x1], 0 }
   0x2   :  { %13 = vsyncpa [#allocation6], 0 }
   0x3   :  { %14 = vsyncpa [#allocation4], 0 }
   0x4   :  { %16 = vsyncpa [#allocation4 + $0x1], 0  ;;  %s713_s18 = smov 0   ;;  %s715_s19 = smov 0  }
   0x5   :  { %s717_s20 = smov 0   ;;  %s719_s21 = smov 0  }
   0x6 LB: > { %s734_s22 = sadd.s32 4294967295, %s674_s21   ;;  %s454_s23 = sadd.s32 4294967294, %s674_s21   ;;  %s674_s21 = sphi %s719_s21, %s911_s21   ;;  %s670_s20 = sphi %s717_s20, %s910_s20   ;;  %s666_s19 = sphi %s715_s19, %s909_s19   ;;  %s662_s18 = sphi %s713_s18, %s908_s18  }
   0x7   : > { %p42_p0 = scmp.ne.s32.totalorder %s666_s19, %s662_s18  ;;  %p890_p1 = scmp.eq.s32.totalorder %s734_s22, 0 }
   0x8   : > { %p156_p3 = scmp.eq.s32.totalorder %s454_s23, 1  ;;  %p455_p5 = scmp.ge.s32.totalorder %s674_s21, 1 }
   0x9   : > { %p743_p4 = por %p890_p1, %p42_p0  ;;  %p163_p7 = scmp.lt.s32.totalorder %s674_s21, 3 }
   0xa   : > { %p748_p6 = por %p156_p3, %p42_p0  ;;  %s676_s27 = smov [#allocation5]  }
   0xb   : > { %s894_s24 = scalar_select %p743_p4, 1, 0 }
   0xc   : > { %s895_s25 = scalar_select %p748_p6, 1, 0 }
   0xd   : > { %p753_p8 = pnand %p455_p5, %p163_p7  ;;  %s175_s28 = sshll.u32 %s676_s27, 4  ;;  %s176_s28 = int_to_ptr.vmem [resolvable:$true] %s175_s28 }
   0xe   : > { %s767_s30 = sadd.s32 1, %s674_s21   ;;  %s29_s6 = sadd.s32 1, %s670_s20 }
   0xf   : > { %s896_s26 = scalar_select %p753_p8, 1, 0 }
  0x10   : > { %p493_p9 = pneg %p753_p8  ;;  %s26_s7 = ssub.s32 %s674_s21, %s767_s30 }
  0x11   : > { %s563_s8 = scalar_lea.vmem %s176_s28, 256  ;;  %p571_p5 = scmp.lt.s32.totalorder %s176_s28, %s176_s28 }
  0x12   : > { %p762_p11 = pnand %p493_p9, %p890_p1  ;;  %p564_p13 = scmp.ne.s32.totalorder %s176_s28, %s563_s8 }
  0x13   : > { %p572_p7 = scmp.lt.s32.totalorder %s563_s8, %s563_s8 }
  0x14   : > { %p554_p12 = pneg %p762_p11 }
  0x15   : > { %p573_p10 = por %p572_p7, %p571_p5 }
  0x16   : > { %p566_p0 = pnand %p564_p13, %p554_p12 }
  0x18   : > { %p567_p3 = pneg %p566_p0 }
  0x1a   : > { %p574_p2 = pnand %p573_p10, %p567_p3 }
  0x1c   : > { %577 = shalt.err (!%p574_p2)
}
  0x1d   : > { %s677_s9 = smov 64   ;;  %s678_s10 = smov 4  }
  0x1e   : > { %496 = dma.hbm_to_vmem [thread:$0]  (!%p762_p11), %s885_s1, 256, %s176_s28, [#allocation6], %s677_s9, %s677_s9, %s678_s10  }
  0x1f   : > { %p27_p9 = scmp.eq.s32.totalorder %s26_s7, 0  ;;  %p36_p12 = scmp.ne.s32.totalorder %s670_s20, %s666_s19 }
  0x20   : > { %p37_p10 = scmp.eq.s32.totalorder %s674_s21, 0  ;;  %p506_p2 = scmp.lt.s32.totalorder %s674_s21, 2 }
  0x21   : > { %s784_s13 = scalar_select %p27_p9, %s670_s20, %s29_s6  }
  0x22   : > { %p38_p13 = por %p37_p10, %p36_p12  ;;  %p898_p0 = scmp.eq.s32.totalorder %s734_s22, 1 }
  0x23   : > { %s198_s15 = sand.u32 1, %s670_s20   ;;  %s459_s16 = sshll.u32 %s674_s21, 7 }
  0x24   : > { %p788_p3 = por %p898_p0, %p36_p12  ;;  %s458_s17 = sshll.u32 %s198_s15, 3 }
  0x25   : > { %s797_s29 = scalar_lea.hbm %s884_s0, %s459_s16  ;;  %s202_s28 = scalar_lea.vmem [#allocation2], %s458_s17 }
  0x26   : > { %s899_s14 = scalar_select %p788_p3, 1, 0 }
  0x27   : > { %s209_s6 = sshll.u32 %s202_s28, 4  ;;  %p799_p11 = pnand %p506_p2, %p38_p13  ;;  %s210_s6 = int_to_ptr.vmem [resolvable:$true] %s209_s6 }
  0x28   : > { %s199_s8 = scalar_lea.sflag [#allocation3], %s198_s15  ;;  %s578_s9 = scalar_lea.hbm %s797_s29, 128 }
  0x29   : > { %p579_p5 = scmp.ne.s32.totalorder %s797_s29, %s578_s9  ;;  %p580_p7 = pneg %p799_p11 }
  0x2a   : > { %s583_s12 = scalar_lea.hbm %s884_s0, 256  ;;  %p584_p10 = scmp.lt.s32.totalorder %s797_s29, %s884_s0 }
  0x2b   : > { %p581_p9 = pnand %p580_p7, %p579_p5  ;;  %p585_p2 = scmp.lt.s32.totalorder %s583_s12, %s578_s9 }
  0x2d   : > { %p582_p12 = pneg %p581_p9  ;;  %p586_p13 = por %p585_p2, %p584_p10 }
  0x2f   : > { %p587_p0 = pnand %p586_p13, %p582_p12 }
  0x31   : > { %590 = shalt.err (!%p587_p0)
}
  0x32   : > { %s591_s23 = scalar_lea.vmem %s210_s6, 128  ;;  %s679_s15 = smov [#allocation2]  }
  0x33   : > { %p592_p1 = scmp.ne.s32.totalorder %s210_s6, %s591_s23  ;;  %s596_s27 = sshll.u32 %s679_s15, 4  ;;  %s597_s27 = int_to_ptr.vmem [resolvable:$false] %s596_s27 }
  0x34   : > { %s598_s28 = scalar_lea.vmem %s597_s27, 256  ;;  %p599_p5 = scmp.lt.s32.totalorder %s210_s6, %s597_s27 }
  0x35   : > { %p594_p6 = pnand %p592_p1, %p580_p7  ;;  %p600_p9 = scmp.lt.s32.totalorder %s598_s28, %s591_s23 }
  0x37   : > { %p595_p3 = pneg %p594_p6  ;;  %p601_p4 = por %p600_p9, %p599_p5 }
  0x39   : > { %p602_p8 = pnand %p601_p4, %p595_p3 }
  0x3b   : > { %605 = shalt.err (!%p602_p8)
}
  0x3c   : > { %500 = dma.hbm_to_vmem [thread:$0]  (!%p799_p11), %s797_s29, 128, %s210_s6, %s199_s8  }
  0x3d   : > { %p901_p12 = scmp.ne.s32.totalorder %s896_s26, 0 }
  0x3e   : > { %s820_s9 = sand.u32 (!%p901_p12), 1, %s666_s19   ;;  %p902_p1 = scmp.ne.s32.totalorder (!%p901_p12), %s894_s24, 0 }
  0x3f   : > { %218 = sbr.rel (%p901_p12) target bundleno = 617 (0x269), region = 40  ;;  %s461_s10 = sshll.u32 (!%p901_p12), %s820_s9, 3 }
  0x40   : > { %s221_s11 = scalar_lea.sflag (!%p901_p12), [#allocation3], %s820_s9  ;;  %s224_s12 = scalar_lea.vmem (!%p901_p12), [#allocation2], %s461_s10 }
  0x44   : > { %649 = dma.done.wait (%p902_p1), %s221_s11, 128  }
  0x45   : > { %651 = vsyncadd (%p902_p1), %s221_s11, 4294967168  ;;  %p903_p4 = scmp.eq.s32.totalorder %s734_s22, 0 }
  0x47   : > { %653 = dma.done.wait (%p903_p4), [#allocation6], 256   ;;  %p904_p6 = pmov %p903_p4 }
  0x48   : > { %v680_v0 = vmov 0.0   ;;  %vm681_vm0 = vmmov 0   ;;  %v546_v1 = vld [vmem:[#allocation5 + $0x8] sm:$0xff]   ;;  %v547_v2 = vld [vmem:[#allocation5] sm:$0xff]   ;;  %v256_v3 = vld [vmem:[%s224_s12] sm:$0xff]  ;;  %vm281_vm1 = vcmask 261120  }
  0x49   : > { %655 = vsyncadd (%p904_p6), [#allocation6], 4294967040  ;;  %477 = vmatprep.subr.bf16.mxu0 %v680_v0  ;;  %481 = vmatprep.mubr.msk.bf16.mxu0 %vm681_vm0, %v680_v0  ;;  %v257_v4 = vpack.c.bf16 %v256_v3, %v256_v3  ;;  %v464_v5 = vld [vmem:[%s886_s2] ss:$0 sm:$0xff]  ;;  %s471_s16 = sshll.u32 %s734_s22, 7  ;;  %s254_s17 = scalar_lea.vmem [#allocation7], %s461_s10 }
  0x4a   : > { %478 = vmatpush3.bf16.msra.mxu0 %v546_v1  ;;  %v468_v26 = vld [vmem:[%s887_s3] ss:$0 sm:$0xff]  ;;  %s374_s23 = sshll.u32 %s254_s17, 4  ;;  %s372_s28 = scalar_lea.hbm %s889_s5, %s471_s16  ;;  %s375_s23 = int_to_ptr.vmem [resolvable:$true] %s374_s23 }
  0x4b   : > { %479 = vmatprep.subr.bf16.mxu0 %v680_v0  ;;  %v469_v28 = vld [vmem:[%s888_s4] ss:$0 sm:$0xff]  ;;  %s361_s11 = scalar_lea.sflag [#allocation4], %s820_s9  ;;  %s606_s12 = scalar_lea.vmem %s375_s23, 128 }
  0x4c   : > { %p607_p8 = scmp.ne.s32.totalorder %s375_s23, %s606_s12  ;;  %p905_p3 = scmp.ne.s32.totalorder %s899_s14, 0 }
  0x4d   : > { %s682_s24 = smov [#allocation7]  }
  0x4e   : > { %480 = vmatpush3.bf16.msra.mxu0 %v547_v2  ;;  %p608_p11 = pnand %p607_p8, %p905_p3  ;;  %s610_s22 = sshll.u32 %s682_s24, 4  ;;  %s611_s22 = int_to_ptr.vmem [resolvable:$false] %s610_s22 }
  0x4f   : > { %s612_s10 = scalar_lea.vmem %s611_s22, 256  ;;  %p613_p10 = scmp.lt.s32.totalorder %s375_s23, %s611_s22 }
  0x50   : > { %p609_p7 = pneg %p608_p11  ;;  %p614_p2 = scmp.lt.s32.totalorder %s612_s10, %s606_s12 }
  0x51   : > { %482 = vmatmul.mubr.msk.bf16.vlgmr.msra.gmra.mxu0 %vm281_vm1, %v257_v4 }
  0x52   : > { %p615_p13 = por %p614_p2, %p613_p10 }
  0x54   : > { %p616_p0 = pnand %p615_p13, %p609_p7 }
 0x111   : > { %v319_v6 = vpop.f32.mrf.mxu0 }
 0x112   : > { %v320_v7 = vadd.f32 %v464_v5, %v319_v6 }
 0x113   : > { %v483_v8 = vpop.f32.mrf.mxu0 }
 0x114   : > { %v326_v9 = vmul.f32 0.70710677, %v320_v7  ;;  %v325_v13 = vmul.f32 0.5, %v320_v7 }
 0x115   : > { %v322_v10 = vpop.f32.mrf.mxu0 }
 0x116   : > { %548 = verf.f32 %v326_v9 }
 0x117   : > { %v484_v11 = vpop.f32.mrf.mxu0 }
 0x123   : > { %v549_v12 = vpop.eup %548 }
 0x124   : > { %v328_v14 = vadd.f32 1.0, %v549_v12 }
 0x126   : > { %v329_v15 = vmul.f32 %v328_v14, %v325_v13 }
 0x128   : > { %v330_v16 = vsel %vm281_vm1, %v329_v15, 0.0 }
 0x129   : > { %331 = vadd.xlane.f32.xlu0 %v330_v16 }
 0x1b2   : > { %v332_v17 = vpop.xlane.xlu0 %331 }
 0x1b3   : > { %v333_v18 = vmul.f32 0.03125, %v332_v17 }
 0x1b5   : > { %v334_v19 = vsub.f32 %v329_v15, %v333_v18 }
 0x1b7   : > { %v335_v20 = vmul.f32 %v334_v19, %v334_v19 }
 0x1b9   : > { %v336_v21 = vsel %vm281_vm1, %v335_v20, 0.0 }
 0x1ba   : > { %337 = vadd.xlane.f32.xlu0 %v336_v21 }
 0x243   : > { %v338_v22 = vpop.xlane.xlu0 %337 }
 0x244   : > { %v339_v23 = vmul.f32 0.03125, %v338_v22 }
 0x246   : > { %v340_v24 = vadd.f32 1e-12, %v339_v23 }
 0x248   : > { %550 = vrsqrt.f32 %v340_v24 }
 0x255   : > { %v551_v25 = vpop.eup %550 }
 0x256   : > { %v342_v27 = vmul.f32 %v551_v25, %v334_v19 }
 0x258   : > { %v350_v29 = vmul.f32 %v468_v26, %v342_v27 }
 0x25a   : > { %v358_v30 = vadd.f32 %v469_v28, %v350_v29 }
 0x25c   : > { %359 = vst.msk [vmem:[%s254_s17] sm:$0xff] %vm281_vm1, %v358_v30 }
 0x25d   : > { %619 = shalt.err (!%p616_p0)
}
 0x25e   : > { %s620_s26 = scalar_lea.hbm %s372_s28, 128  ;;  %s624_s6 = scalar_lea.hbm %s889_s5, 256 }
 0x25f   : > { %p621_p5 = scmp.ne.s32.totalorder %s372_s28, %s620_s26  ;;  %p625_p1 = scmp.lt.s32.totalorder %s372_s28, %s889_s5 }
 0x260   : > { %p626_p4 = scmp.lt.s32.totalorder %s624_s6, %s620_s26 }
 0x261   : > { %p622_p9 = pnand %p621_p5, %p905_p3 }
 0x262   : > { %p627_p6 = por %p626_p4, %p625_p1 }
 0x263   : > { %p623_p12 = pneg %p622_p9 }
 0x265   : > { %p628_p8 = pnand %p627_p6, %p623_p12 }
 0x267   : > { %631 = shalt.err (!%p628_p8)
}
 0x268   : > { %491 = dma.vmem_to_hbm [thread:$0]  (%p905_p3), %s375_s23, 128, %s372_s28, %s361_s11  }
 0x269 PF: > { %s386_s16 = sand.u32 1, %s662_s18   ;;  %p906_p11 = scmp.ne.s32.totalorder %s895_s25, 0 }
 0x26a   : > { %p907_p7 = scmp.ge.s32.totalorder %s674_s21, 2  ;;  %s387_s17 = scalar_lea.sflag [#allocation4], %s386_s16 }
 0x26c   : > { %p502_p10 = pnand %p907_p7, %p906_p11 }
 0x26e   : > { %p503_p2 = pneg %p502_p10 }
 0x270   : > { %657 = dma.done.wait (%p503_p2), %s387_s17, 128  }
 0x271   : > { %659 = vsyncadd (%p503_p2), %s387_s17, 4294967168  ;;  %p19_p13 = scmp.ge.s32.totalorder %s767_s30, 4   ;;  %s908_s18 = smov %s666_s19 }
 0x272   : > { %s909_s19 = smov %s670_s20  ;;  %s910_s20 = smov %s784_s13 }
 0x273   : > { %s911_s21 = smov %s767_s30  ;;  %21 = sbr.rel (!%p19_p13) target bundleno = 6 (0x6), region = 89 }
 0x278   :  { %392 = vsyncpa [#allocation3], 1 }
 0x279   :  { %394 = vsyncpa [#allocation3 + $0x1], 1 }
 0x27a   :  { %395 = vsyncpa [#allocation6], 1 }
 0x27b   :  { %396 = vsyncpa [#allocation4], 1 }
 0x27c   :  { %398 = vsyncpa [#allocation4 + $0x1], 1 }

</bundles_post_ra>
